<compile_context>
chip_gen: v7x
topology: tpu7x:2x2x1
jax: 0.10.0
libtpu: 0.0.40
codegen_flags: <defaults>
</compile_context>

<pallas_src>
import jax
import jax.numpy as jnp
from jax.experimental import pallas as pl
from jax.experimental.pallas import tpu as pltpu

GROUP = 8  # rows packed per lane-dense grouped row (8 * 16 features = 128 lanes)


def pownet_kernel(x_ref, w1_ref, b1_ref, wf_ref, bf_ref, o_ref):
    # fc1 (block-diagonal, one MXU pass for 8 batch rows per grouped row) + ReLU
    h = jnp.dot(x_ref[...], w1_ref[...], preferred_element_type=jnp.float32) + b1_ref[...]
    h = jnp.maximum(h, 0.0)
    # fused fc11+fc2 (block-diagonal, single MXU pass)
    z = jnp.dot(h, wf_ref[...], preferred_element_type=jnp.float32) + bf_ref[...]
    # sigmoid(z)*2 + 1 == tanh(z/2) + 2  (exact identity, single EUP op)
    o_ref[...] = jnp.tanh(0.5 * z) + 2.0


def fuse_params(params):
    """Fold fc11 into fc2: (h @ w11 + b11) @ w2 + b2 == h @ (w11 @ w2) + (b11 @ w2 + b2)."""
    w1, b1, w11, b11, w2, b2 = params
    wf = jnp.dot(w11, w2)          # [32, 10]
    bf = jnp.dot(b11, w2) + b2     # [1, 10]
    return w1, b1, wf, bf


def pownet_forward(x, params, *, batch_tile=32768, group=GROUP):
    """x: [B, inputdim] in the producer's dtype (f32 or bf16). Returns [B, 10] f32."""
    w1, b1, wf, bf = fuse_params(params)
    B, inputdim = x.shape
    hidden = w1.shape[1]    # 32
    out_dim = wf.shape[1]   # 10
    io_dtype = x.dtype      # transfer dtype of x (accumulation stays f32 on the MXU)

    # Pad features so group * din_p is a multiple of 128 (lane-dense grouped rows).
    # No-op for inputdim == 16 (the powerinput != 1 configuration).
    din_p = ((inputdim + 15) // 16) * 16
    if din_p != inputdim:
        x = jnp.pad(x, ((0, 0), (0, din_p - inputdim)))
        w1 = jnp.pad(w1, ((0, din_p - inputdim), (0, 0)))

    # Pad batch to a multiple of `group`; padding rows are sliced off at the end.
    Bp = ((B + group - 1) // group) * group
    if Bp != B:
        x = jnp.pad(x, ((0, Bp - B), (0, 0)))
    Bg = Bp // group

    # Block-diagonal weights: one grouped row carries `group` independent samples.
    w1_bd = jnp.kron(jnp.eye(group, dtype=w1.dtype), w1).astype(io_dtype)  # [g*din_p, g*hid]
    b1_bd = jnp.tile(b1, (1, group))                                       # [1, g*hid] f32
    wf_bd = jnp.kron(jnp.eye(group, dtype=wf.dtype), wf)                   # [g*hid, g*out] f32
    bf_bd = jnp.tile(bf, (1, group))                                       # [1, g*out] f32

    xg = x.reshape(Bg, group * din_p)   # row-contiguous regroup: metadata-only

    din_g = group * din_p
    hid_g = group * hidden
    out_g = group * out_dim

    # Grouped-batch tile: as large as fits (per-step overhead ~0.35us), sublane-aligned.
    tbg = min(Bg, max(1, batch_tile // group))
    if tbg < Bg:
        tbg = min(Bg, max(16, (tbg // 16) * 16))
    grid = (pl.cdiv(Bg, tbg),)

    itemsize = jnp.dtype(io_dtype).itemsize
    cost = pl.CostEstimate(
        flops=2 * Bg * (din_g * hid_g + hid_g * out_g),
        transcendentals=Bg * out_g,
        bytes_accessed=(Bg * din_g * itemsize            # x read
                        + Bg * out_g * 4                 # out write (f32)
                        + din_g * hid_g * itemsize       # resident weights (read once)
                        + hid_g * out_g * 4
                        + (hid_g + out_g) * 4),
    )

    out = pl.pallas_call(
        pownet_kernel,
        out_shape=jax.ShapeDtypeStruct((Bg, out_g), jnp.float32),
        grid=grid,
        in_specs=[
            pl.BlockSpec((tbg, din_g), lambda i: (i, 0)),    # x: tiled over grouped batch
            pl.BlockSpec((din_g, hid_g), lambda i: (0, 0)),  # weights/biases: VMEM-resident
            pl.BlockSpec((1, hid_g), lambda i: (0, 0)),
            pl.BlockSpec((hid_g, out_g), lambda i: (0, 0)),
            pl.BlockSpec((1, out_g), lambda i: (0, 0)),
        ],
        out_specs=pl.BlockSpec((tbg, out_g), lambda i: (i, 0)),
        compiler_params=pltpu.CompilerParams(
            dimension_semantics=("parallel",),   # batch loop: shard across v7x's 2 TCs
            vmem_limit_bytes=32 * 1024 * 1024,   # lane-dense tiles keep us well under this
        ),
        cost_estimate=cost,
    )(xg, w1_bd, b1_bd, wf_bd, bf_bd)

    return out.reshape(Bp, out_dim)[:B]


def init_params(key, inputdim):
    """Deterministic init; shapes mirror nn.Linear(inputdim,32), (32,16), (16,10)."""
    k1, k2, k3, k4, k5, k6 = jax.random.split(key, 6)

    def lin(kw, kb, fan_in, fan_out):
        bound = 1.0 / jnp.sqrt(fan_in)
        w = jax.random.uniform(kw, (fan_in, fan_out), jnp.float32, -bound, bound)
        b = jax.random.uniform(kb, (1, fan_out), jnp.float32, -bound, bound)
        return w, b

    w1, b1 = lin(k1, k2, inputdim, 32)
    w11, b11 = lin(k3, k4, 32, 16)
    w2, b2 = lin(k5, k6, 16, 10)
    return (w1, b1, w11, b11, w2, b2)


def pownet_ref(x, params):
    """Unfused pure-JAX reference matching the PyTorch forward."""
    w1, b1, w11, b11, w2, b2 = params
    h = jnp.maximum(x @ w1 + b1, 0.0)
    h = h @ w11 + b11
    h = h @ w2 + b2
    return jax.nn.sigmoid(h) * 2.0 + 1.0


if __name__ == "__main__":
    key = jax.random.PRNGKey(0)
    kx, kx2, kx3, kp = jax.random.split(key, 4)

    B, inputdim = 8, 16  # PowNet(inputdim=16) when powerinput != 1
    x = jax.random.normal(kx, (B, inputdim), jnp.float32)
    params = init_params(kp, inputdim)

    # 1) Small batch, f32 path: exact activation identity -> tight tolerance.
    out = jax.block_until_ready(pownet_forward(x, params))
    ref = pownet_ref(x, params)
    assert out.shape == (B, 10), out.shape
    assert jnp.allclose(out, ref, atol=1e-4, rtol=1e-4), float(jnp.max(jnp.abs(out - ref)))

    # 2) Large batch, multi-tile grid, bf16 transfers (producer-supplied bf16 x).
    B2 = 2048
    x2 = jax.random.normal(kx2, (B2, inputdim), jnp.float32)
    x2_bf16 = x2.astype(jnp.bfloat16)
    out2 = jax.block_until_ready(pownet_forward(x2_bf16, params, batch_tile=512))
    ref2 = pownet_ref(x2_bf16.astype(jnp.float32), params)
    assert out2.shape == (B2, 10), out2.shape
    assert jnp.allclose(out2, ref2, atol=1e-2, rtol=1e-2), float(jnp.max(jnp.abs(out2 - ref2)))

    # 3) Ragged batch (B % group != 0 and ragged last grid tile), f32 path.
    B3 = 200
    x3 = jax.random.normal(kx3, (B3, inputdim), jnp.float32)
    out3 = jax.block_until_ready(pownet_forward(x3, params, batch_tile=128))
    ref3 = pownet_ref(x3, params)
    assert out3.shape == (B3, 10), out3.shape
    assert jnp.allclose(out3, ref3, atol=1e-4, rtol=1e-4), float(jnp.max(jnp.abs(out3 - ref3)))

    print("KERNEL_OK")
</pallas_src>

<mosaic_0001>
module attributes {stable_mosaic.version = 11 : i64} {
  func.func @pownet_kernel(%arg0: i32, %arg1: memref<1x128xf32, #tpu.memory_space<vmem>>, %arg2: memref<128x256xf32, #tpu.memory_space<vmem>>, %arg3: memref<1x256xf32, #tpu.memory_space<vmem>>, %arg4: memref<256x80xf32, #tpu.memory_space<vmem>>, %arg5: memref<1x80xf32, #tpu.memory_space<vmem>>, %arg6: memref<1x80xf32, #tpu.memory_space<vmem>>) attributes {dimension_semantics = [#tpu.dimension_semantics<parallel>], iteration_bounds = array<i64: 1>, scalar_prefetch = 0 : i64, scratch_operands = 0 : i64, tpu.core_type = #tpu.core_type<tc>, window_params = [{transform_indices = @transform_0, window_bounds = array<i64: 1, 128>}, {pipeline_mode = #tpu.pipeline_mode<synchronous>, transform_indices = @transform_1, window_bounds = array<i64: 128, 256>}, {pipeline_mode = #tpu.pipeline_mode<synchronous>, transform_indices = @transform_2, window_bounds = array<i64: 1, 256>}, {pipeline_mode = #tpu.pipeline_mode<synchronous>, transform_indices = @transform_3, window_bounds = array<i64: 256, 80>}, {pipeline_mode = #tpu.pipeline_mode<synchronous>, transform_indices = @transform_4, window_bounds = array<i64: 1, 80>}, {transform_indices = @transform_5, window_bounds = array<i64: 1, 80>}]} {
    %c0 = arith.constant 0 : index
    %c0_0 = arith.constant 0 : index
    %0 = vector.load %arg1[%c0, %c0_0] : memref<1x128xf32, #tpu.memory_space<vmem>>, vector<1x128xf32>
    %c0_1 = arith.constant 0 : index
    %c0_2 = arith.constant 0 : index
    %1 = vector.load %arg2[%c0_1, %c0_2] : memref<128x256xf32, #tpu.memory_space<vmem>>, vector<128x256xf32>
    %cst = arith.constant dense<0.000000e+00> : vector<1x256xf32>
    %2 = tpu.matmul %0, %1, %cst {dimension_numbers = #tpu.dot_dimension_numbers<[1], [0], [0], [1], [0, 0, 1, 1], [], []>} : vector<1x128xf32>, vector<128x256xf32>, vector<1x256xf32> -> vector<1x256xf32>
    %c0_3 = arith.constant 0 : index
    %c0_4 = arith.constant 0 : index
    %3 = vector.load %arg3[%c0_3, %c0_4] : memref<1x256xf32, #tpu.memory_space<vmem>>, vector<1x256xf32>
    %4 = arith.addf %2, %3 : vector<1x256xf32>
    %cst_5 = arith.constant 0.000000e+00 : f32
    %5 = vector.broadcast %cst_5 : f32 to vector<1x256xf32>
    %6 = arith.maximumf %4, %5 : vector<1x256xf32>
    %c0_6 = arith.constant 0 : index
    %c0_7 = arith.constant 0 : index
    %7 = vector.load %arg4[%c0_6, %c0_7] : memref<256x80xf32, #tpu.memory_space<vmem>>, vector<256x80xf32>
    %cst_8 = arith.constant dense<0.000000e+00> : vector<1x80xf32>
    %8 = tpu.matmul %6, %7, %cst_8 {dimension_numbers = #tpu.dot_dimension_numbers<[1], [0], [0], [1], [0, 0, 1, 1], [], []>} : vector<1x256xf32>, vector<256x80xf32>, vector<1x80xf32> -> vector<1x80xf32>
    %c0_9 = arith.constant 0 : index
    %c0_10 = arith.constant 0 : index
    %9 = vector.load %arg5[%c0_9, %c0_10] : memref<1x80xf32, #tpu.memory_space<vmem>>, vector<1x80xf32>
    %10 = arith.addf %8, %9 : vector<1x80xf32>
    %cst_11 = arith.constant 5.000000e-01 : f32
    %11 = vector.broadcast %cst_11 : f32 to vector<1x80xf32>
    %12 = arith.mulf %11, %10 : vector<1x80xf32>
    %13 = math.tanh %12 : vector<1x80xf32>
    %cst_12 = arith.constant 2.000000e+00 : f32
    %14 = vector.broadcast %cst_12 : f32 to vector<1x80xf32>
    %15 = arith.addf %13, %14 : vector<1x80xf32>
    %c0_13 = arith.constant 0 : index
    %c0_14 = arith.constant 0 : index
    %16 = vector.load %arg6[%c0_13, %c0_14] : memref<1x80xf32, #tpu.memory_space<vmem>>, vector<1x80xf32>
    tpu.vector_store %arg6[%c0_13, %c0_14], %15 {strides = array<i32>} : memref<1x80xf32, #tpu.memory_space<vmem>>, vector<1x80xf32>,
    return
  }
  func.func @transform_0(%arg0: i32) -> (i32, i32) {
    %c0_i32 = arith.constant 0 : i32
    %c0_i32_0 = arith.constant 0 : i32
    return %arg0, %c0_i32 : i32, i32
  }
  func.func @transform_1(%arg0: i32) -> (i32, i32) {
    %c0_i32 = arith.constant 0 : i32
    %c0_i32_0 = arith.constant 0 : i32
    %c0_i32_1 = arith.constant 0 : i32
    return %c0_i32, %c0_i32_0 : i32, i32
  }
  func.func @transform_2(%arg0: i32) -> (i32, i32) {
    %c0_i32 = arith.constant 0 : i32
    %c0_i32_0 = arith.constant 0 : i32
    %c0_i32_1 = arith.constant 0 : i32
    return %c0_i32, %c0_i32_0 : i32, i32
  }
  func.func @transform_3(%arg0: i32) -> (i32, i32) {
    %c0_i32 = arith.constant 0 : i32
    %c0_i32_0 = arith.constant 0 : i32
    %c0_i32_1 = arith.constant 0 : i32
    return %c0_i32, %c0_i32_0 : i32, i32
  }
  func.func @transform_4(%arg0: i32) -> (i32, i32) {
    %c0_i32 = arith.constant 0 : i32
    %c0_i32_0 = arith.constant 0 : i32
    %c0_i32_1 = arith.constant 0 : i32
    return %c0_i32, %c0_i32_0 : i32, i32
  }
  func.func @transform_5(%arg0: i32) -> (i32, i32) {
    %c0_i32 = arith.constant 0 : i32
    %c0_i32_0 = arith.constant 0 : i32
    return %arg0, %c0_i32 : i32, i32
  }
}

</mosaic_0001>

<bundles_post_ra>
// kernel: tpu_custom_call.1
= control target key start
LH: loop header
LB: loop body
LE: loop exit
PB: predicated region body
PF: predicated region fallthrough
CT: control target
= control target key end

     0   :  { %v388_v7 = vmov 0.0   ;;  %s633_s0 = inlined_call_operand.vmem [shape: f32[1,128], index: 0, kind: input, shape index: {}]   ;;  %s634_s1 = inlined_call_operand.vmem [shape: f32[128,256], index: 1, kind: input, shape index: {}]   ;;  %s635_s2 = inlined_call_operand.vmem [shape: f32[1,256], index: 2, kind: input, shape index: {}]   ;;  %s636_s3 = inlined_call_operand.vmem [shape: f32[256,80], index: 3, kind: input, shape index: {}]   ;;  %s637_s4 = inlined_call_operand.vmem [shape: f32[1,80], index: 4, kind: input, shape index: {}]   ;;  %s638_s5 = inlined_call_operand.hbm [shape: f32[1,80], index: 5, kind: output, shape index: {}]  }
   0x1   :  { %v23_v0 = vld [vmem:[%s634_s1 + $0x8] sm:$0xff]  ;;  %v25_v1 = vld [vmem:[%s634_s1 + $0x18] sm:$0xff]  ;;  %v22_v2 = vld [vmem:[%s634_s1] sm:$0xff]  ;;  %130 = vmatprep.mubr.f32.mxu0 %v388_v7 }
   0x2   :  { %v296_v3 = vpack.c.bf16 %v25_v1, %v23_v0  ;;  %v24_v4 = vld [vmem:[%s634_s1 + $0x10] sm:$0xff]  ;;  %v27_v5 = vld [vmem:[%s634_s1 + $0x28] sm:$0xff]  ;;  %v29_v6 = vld [vmem:[%s634_s1 + $0x38] sm:$0xff] }
   0x3   :  { %v298_v8 = vpack.c.bf16 %v24_v4, %v22_v2  ;;  %v300_v9 = vpack.c.bf16 %v29_v6, %v27_v5  ;;  %v26_v10 = vld [vmem:[%s634_s1 + $0x20] sm:$0xff]  ;;  %v28_v11 = vld [vmem:[%s634_s1 + $0x30] sm:$0xff]  ;;  %v31_v12 = vld [vmem:[%s634_s1 + $0x48] sm:$0xff] }
   0x4   :  { %297 = vmatprep.subr.bf16.mxu0 %v296_v3  ;;  %v33_v13 = vld [vmem:[%s634_s1 + $0x58] sm:$0xff]  ;;  %v302_v14 = vpack.c.bf16 %v28_v11, %v26_v10  ;;  %v30_v16 = vld [vmem:[%s634_s1 + $0x40] sm:$0xff]  ;;  %v32_v17 = vld [vmem:[%s634_s1 + $0x50] sm:$0xff] }
   0x5   :  { %299 = vmatpush1.bf16.msra.mxu0 %v298_v8  ;;  %v304_v15 = vpack.c.bf16 %v33_v13, %v31_v12  ;;  %v35_v18 = vld [vmem:[%s634_s1 + $0x68] sm:$0xff]  ;;  %v37_v19 = vld [vmem:[%s634_s1 + $0x78] sm:$0xff]  ;;  %v306_v20 = vpack.c.bf16 %v32_v17, %v30_v16  ;;  %v34_v22 = vld [vmem:[%s634_s1 + $0x60] sm:$0xff] }
   0x6   :  { %301 = vmatprep.subr.bf16.mxu0 %v300_v9  ;;  %v308_v21 = vpack.c.bf16 %v37_v19, %v35_v18  ;;  %v36_v23 = vld [vmem:[%s634_s1 + $0x70] sm:$0xff]  ;;  %v39_v24 = vld [vmem:[%s634_s1 + $0x88] sm:$0xff]  ;;  %v41_v25 = vld [vmem:[%s634_s1 + $0x98] sm:$0xff] }
   0x7   :  { %v38_v26 = vld [vmem:[%s634_s1 + $0x80] sm:$0xff]  ;;  %v40_v27 = vld [vmem:[%s634_s1 + $0x90] sm:$0xff]  ;;  %v156_v29 = vld [vmem:[%s636_s3 + $0x88] sm:$0xff]  ;;  %v310_v31 = vpack.c.bf16 %v36_v23, %v34_v22  ;;  %v312_v36 = vpack.c.bf16 %v41_v25, %v39_v24 }
   0x8   :  { %v155_v28 = vld [vmem:[%s636_s3 + $0x80] sm:$0xff]  ;;  %v140_v33 = vld [vmem:[%s636_s3 + $0x8] sm:$0xff]  ;;  %v157_v34 = vld [vmem:[%s636_s3 + $0x90] sm:$0xff]  ;;  %v314_v46 = vpack.c.bf16 %v40_v27, %v38_v26 }
   0x9   :  { %303 = vmatpush1.bf16.msra.mxu0 %v302_v14  ;;  %v139_v30 = vld [vmem:[%s636_s3] sm:$0xff]  ;;  %v328_v32 = vpack.c.bf16 %v156_v29, %v155_v28  ;;  %v158_v35 = vld [vmem:[%s636_s3 + $0x98] sm:$0xff]  ;;  %v141_v39 = vld [vmem:[%s636_s3 + $0x10] sm:$0xff] }
   0xa   :  { %305 = vmatprep.subr.bf16.mxu0 %v304_v15  ;;  %v330_v37 = vpack.c.bf16 %v140_v33, %v139_v30  ;;  %v332_v38 = vpack.c.bf16 %v158_v35, %v157_v34  ;;  %v142_v40 = vld [vmem:[%s636_s3 + $0x18] sm:$0xff]  ;;  %v159_v41 = vld [vmem:[%s636_s3 + $0xa0] sm:$0xff]  ;;  %v43_v42 = vld [vmem:[%s634_s1 + $0xa8] sm:$0xff] }
   0xb   :  { %v45_v43 = vld [vmem:[%s634_s1 + $0xb8] sm:$0xff]  ;;  %329 = vmatprep.subr.bf16.mxu1 %v328_v32  ;;  %v160_v44 = vld [vmem:[%s636_s3 + $0xa8] sm:$0xff]  ;;  %v334_v45 = vpack.c.bf16 %v142_v40, %v141_v39  ;;  %v42_v47 = vld [vmem:[%s634_s1 + $0xa0] sm:$0xff] }
   0xc   :  { %331 = vmatpush3.bf16.msra.mxu1 %v330_v37  ;;  %v336_v48 = vpack.c.bf16 %v160_v44, %v159_v41  ;;  %v143_v49 = vld [vmem:[%s636_s3 + $0x20] sm:$0xff]  ;;  %v144_v50 = vld [vmem:[%s636_s3 + $0x28] sm:$0xff]  ;;  %v316_v51 = vpack.c.bf16 %v45_v43, %v43_v42  ;;  %v44_v52 = vld [vmem:[%s634_s1 + $0xb0] sm:$0xff] }
   0xd   :  { %307 = vmatpush1.bf16.msra.mxu0 %v306_v20  ;;  %333 = vmatprep.subr.bf16.mxu1 %v332_v38  ;;  %v161_v53 = vld [vmem:[%s636_s3 + $0xb0] sm:$0xff]  ;;  %v162_v54 = vld [vmem:[%s636_s3 + $0xb8] sm:$0xff]  ;;  %v47_v55 = vld [vmem:[%s634_s1 + $0xc8] sm:$0xff]  ;;  %v338_v58 = vpack.c.bf16 %v144_v50, %v143_v49  ;;  %v318_v59 = vpack.c.bf16 %v44_v52, %v42_v47 }
   0xe   :  { %309 = vmatprep.subr.bf16.mxu0 %v308_v21  ;;  %v49_v56 = vld [vmem:[%s634_s1 + $0xd8] sm:$0xff]  ;;  %v46_v57 = vld [vmem:[%s634_s1 + $0xc0] sm:$0xff]  ;;  %v340_v60 = vpack.c.bf16 %v162_v54, %v161_v53  ;;  %v145_v61 = vld [vmem:[%s636_s3 + $0x30] sm:$0xff] }
   0xf   :  { %v146_v62 = vld [vmem:[%s636_s3 + $0x38] sm:$0xff] }
  0x10   :  { %335 = vmatpush3.bf16.msra.mxu1 %v334_v45 }
  0x11   :  { %311 = vmatpush1.bf16.msra.mxu0 %v310_v31  ;;  %337 = vmatprep.subr.bf16.mxu1 %v336_v48 }
  0x12   :  { %313 = vmatprep.subr.bf16.mxu0 %v312_v36 }
  0x15   :  { %315 = vmatpush1.bf16.msra.mxu0 %v314_v46 }
  0x16   :  { %10 = vsyncpa [#allocation3], 0  ;;  %317 = vmatprep.subr.bf16.mxu0 %v316_v51  ;;  %v320_v63 = vpack.c.bf16 %v49_v56, %v47_v55  ;;  %v48_v0 = vld [vmem:[%s634_s1 + $0xd0] sm:$0xff]  ;;  %v163_v1 = vld [vmem:[%s636_s3 + $0xc0] sm:$0xff]  ;;  %339 = vmatpush3.bf16.msra.mxu1 %v338_v58  ;;  %v342_v5 = vpack.c.bf16 %v146_v62, %v145_v61  ;;  %v56_v34 = vlaneseq  ;;  %vm245_vm0 = vcmask 647168  }
  0x17   :  { %v164_v2 = vld [vmem:[%s636_s3 + $0xc8] sm:$0xff]  ;;  %v53_v4 = vld [vmem:[%s634_s1 + $0xf8] sm:$0xff]  ;;  %v322_v6 = vpack.c.bf16 %v48_v0, %v46_v57  ;;  %v50_v7 = vld [vmem:[%s634_s1 + $0xe0] sm:$0xff]  ;;  %341 = vmatprep.subr.bf16.mxu1 %v340_v60 }
  0x18   :  { %v51_v3 = vld [vmem:[%s634_s1 + $0xe8] sm:$0xff]  ;;  %v344_v8 = vpack.c.bf16 %v164_v2, %v163_v1  ;;  %v147_v9 = vld [vmem:[%s636_s3 + $0x40] sm:$0xff]  ;;  %v52_v12 = vld [vmem:[%s634_s1 + $0xf0] sm:$0xff]  ;;  %v57_v35 = vshrl.u32 %v56_v34, 7 }
  0x19   :  { %319 = vmatpush1.bf16.msra.mxu0 %v318_v59  ;;  %v148_v10 = vld [vmem:[%s636_s3 + $0x48] sm:$0xff]  ;;  %v324_v11 = vpack.c.bf16 %v53_v4, %v51_v3  ;;  %v165_v13 = vld [vmem:[%s636_s3 + $0xd0] sm:$0xff]  ;;  %v166_v14 = vld [vmem:[%s636_s3 + $0xd8] sm:$0xff]  ;;  %v326_v16 = vpack.c.bf16 %v52_v12, %v50_v7 }
  0x1a   :  { %321 = vmatprep.subr.bf16.mxu0 %v320_v63  ;;  %343 = vmatpush3.bf16.msra.mxu1 %v342_v5  ;;  %v346_v15 = vpack.c.bf16 %v148_v10, %v147_v9  ;;  %v348_v17 = vpack.c.bf16 %v166_v14, %v165_v13  ;;  %v149_v18 = vld [vmem:[%s636_s3 + $0x50] sm:$0xff]  ;;  %v150_v19 = vld [vmem:[%s636_s3 + $0x58] sm:$0xff]  ;;  %v167_v20 = vld [vmem:[%s636_s3 + $0xe0] sm:$0xff]  ;;  %v58_v36 = vsub.s32 0, %v57_v35  ;;  %v62_v38 = vsub.s32 1, %v57_v35 }
  0x1b   :  { %345 = vmatprep.subr.bf16.mxu1 %v344_v8  ;;  %v168_v21 = vld [vmem:[%s636_s3 + $0xe8] sm:$0xff]  ;;  %v350_v22 = vpack.c.bf16 %v150_v19, %v149_v18  ;;  %v21_v23 = vld [vmem:[%s633_s0] sm:$0x1]  ;;  %v169_v28 = vld [vmem:[%s636_s3 + $0xf0] sm:$0xff] }
  0x1c   :  { %v352_v24 = vpack.c.bf16 %v168_v21, %v167_v20  ;;  %v151_v25 = vld [vmem:[%s636_s3 + $0x60] sm:$0xff]  ;;  %v152_v26 = vld [vmem:[%s636_s3 + $0x68] sm:$0xff]  ;;  %v170_v29 = vld [vmem:[%s636_s3 + $0xf8] sm:$0xff] }
  0x1d   :  { %323 = vmatpush1.bf16.msra.mxu0 %v322_v6  ;;  %v354_v27 = vpack.c.bf16 %v152_v26, %v151_v25  ;;  %v356_v30 = vpack.c.bf16 %v170_v29, %v169_v28  ;;  %v153_v31 = vld [vmem:[%s636_s3 + $0x70] sm:$0xff]  ;;  %v154_v32 = vld [vmem:[%s636_s3 + $0x78] sm:$0xff]  ;;  %v54_v37 = vld [vmem:[%s635_s2] sm:$0x3]  ;;  %s389_s2 = smov [#allocation2]  }
  0x1e   :  { %325 = vmatprep.subr.bf16.mxu0 %v324_v11  ;;  %347 = vmatpush3.bf16.msra.mxu1 %v346_v15  ;;  %v358_v33 = vpack.c.bf16 %v154_v32, %v153_v31  ;;  %v59_v39 = vrot.slane %v54_v37, %v58_v36  ;;  %v63_v40 = vrot.slane %v54_v37, %v62_v38  ;;  %v171_v48 = vld [vmem:[%s637_s4] sm:$0x1]  ;;  %s253_s24 = sshll.u32 %s389_s2, 4  ;;  %s254_s24 = int_to_ptr.vmem [resolvable:$true] %s253_s24 }
  0x1f   :  { %349 = vmatprep.subr.bf16.mxu1 %v348_v17  ;;  %s364_s25 = scalar_lea.vmem %s254_s24, 16  ;;  %s368_s26 = scalar_lea.vmem %s254_s24, 32 }
  0x20   :  { %p365_p0 = scmp.ne.s32.totalorder %s254_s24, %s364_s25  ;;  %p369_p1 = scmp.lt.s32.totalorder %s254_s24, %s254_s24 }
  0x21   :  { %327 = vmatpush1.bf16.msra.mxu0 %v326_v16  ;;  %p370_p2 = scmp.lt.s32.totalorder %s368_s26, %s364_s25 }
  0x22   :  { %351 = vmatpush3.bf16.msra.mxu1 %v350_v22 }
  0x23   :  { %353 = vmatprep.subr.bf16.mxu1 %v352_v24  ;;  %p371_p3 = por %p370_p2, %p369_p1 }
  0x24   :  { %131 = vmatmul.mubr.f32.vlgmr.msra.gmra.mrb[0].mxu0 %v21_v23 }
  0x25   :  { %p372_p4 = pnand %p371_p3, %p365_p0 }
  0x26   :  { %355 = vmatpush3.bf16.msra.mxu1 %v354_v27 }
  0x27   :  { %357 = vmatprep.subr.bf16.mxu1 %v356_v30 }
  0x2a   :  { %359 = vmatpush3.bf16.msra.mxu1 %v358_v33 }
  0xf7   :  { %v132_v41 = vpop.f32.mrb[0].mxu0 }
  0xf8   :  { %v133_v42 = vadd.f32 %v132_v41, %v59_v39  ;;  %v134_v43 = vpop.f32.mrb[1].mxu0 }
  0xf9   :  { %v135_v44 = vadd.f32 %v134_v43, %v63_v40 }
  0xfa   :  { %v137_v46 = vmax.f32 %v133_v42, 0.0 }
  0xfb   :  { %v138_v45 = vmax.f32 %v135_v44, 0.0 }
  0xfd   :  { %236 = vmatprep.mubr.f32.mxu1 %v138_v45 }
  0xfe   :  { %237 = vmatmul.mubr.f32.vlgmr.msra.gmra.mrb[0].mxu1 %v137_v46 }
 0x1d1   :  { %v293_v47 = vpop.f32.mrb[0].mxu1 }
 0x1d2   :  { %v294_v49 = vpop.f32.mrb[1].mxu1 }
 0x1d3   :  { %v295_v50 = vadd.f32 %v294_v49, %v293_v47 }
 0x1d5   :  { %v239_v51 = vadd.f32 %v295_v50, %v171_v48 }
 0x1d7   :  { %v242_v52 = vmul.f32 0.5, %v239_v51 }
 0x1d9   :  { %362 = vtanh.f32 %v242_v52 }
 0x1e3   :  { %v363_v53 = vpop.eup %362 }
 0x1e4   :  { %v244_v54 = vadd.f32 2.0, %v363_v53 }
 0x1e6   :  { %246 = vst.msk [vmem:[#allocation2] sm:$0x1] %vm245_vm0, %v244_v54 }
 0x1e7   :  { %375 = shalt.err (!%p372_p4)
}
 0x1e8   :  { %s376_s28 = scalar_lea.hbm %s638_s5, 16 }
 0x1e9   :  { %p377_p5 = scmp.ne.s32.totalorder %s638_s5, %s376_s28  ;;  %p380_p6 = scmp.lt.u32.totalorder %s376_s28, %s638_s5 }
 0x1eb   :  { %p382_p7 = pnand %p380_p6, %p377_p5 }
 0x1ed   :  { %385 = shalt.err (!%p382_p7)
}
 0x1ee   :  { %256 = dma.vmem_to_hbm [thread:$0]  %s254_s24, 16, %s638_s5, [#allocation3]  }
 0x1ef   :  { %386 = dma.done.wait [#allocation3], 16  }
 0x1f0   :  { %387 = vsyncadd [#allocation3], 4294967280 }
 0x1f1   :  { %260 = vsyncpa [#allocation3], 1 }

</bundles_post_ra>
